<compile_context>
chip_gen: v5e
topology: v5e:2x2
jax: 0.10.0
libtpu: 0.0.40
codegen_flags: <defaults>
</compile_context>

<pallas_src>
import math

import jax
import jax.numpy as jnp
from jax.experimental import pallas as pl
from jax.experimental.pallas import tpu as pltpu


def _round_up(v, m):
    return (v + m - 1) // m * m


def _pick_tile(padded, t_max, align):
    """Largest tile <= t_max that is a multiple of `align` and divides `padded`."""
    t = max((min(t_max, padded) // align) * align, align)
    while padded % t:
        t -= align
    return t


def _make_kernel(x_resident, tk):
    def kernel(adj_ref, x_ref, w_ref, b_ref, o_ref, acc_ref):
        k = pl.program_id(1)

        @pl.when(k == 0)
        def _init():
            acc_ref[...] = jnp.zeros_like(acc_ref)

        # Per-tile VPU cast of the O(N^2) operand (no-op if adj is already
        # bf16); hidden under the adj DMA.  Accumulation stays f32.
        adj_t = adj_ref[...].astype(jnp.bfloat16)
        if x_resident:
            start = pl.multiple_of(k * tk, 128)
            x_t = x_ref[pl.ds(start, tk), :]
        else:
            x_t = x_ref[...]

        acc_ref[...] += jnp.dot(adj_t, x_t, preferred_element_type=jnp.float32)

        @pl.when(k == pl.num_programs(1) - 1)
        def _finalize():
            # Epilogue (once per output tile): project to F_out (bf16 x bf16
            # on the MXU; precision already bounded by bf16 adj/x), add bias.
            proj = jnp.dot(acc_ref[...].astype(jnp.bfloat16), w_ref[...],
                           preferred_element_type=jnp.float32)
            o_ref[...] = (proj + b_ref[...]).astype(o_ref.dtype)

    return kernel


def spatial_gcn_layer(x, adj, weight, bias, *, tm=256, tk=1024,
                      out_dtype=jnp.float32):
    """x: [N, F_in], adj: [N, N] dense D^-1 A (f32 or bf16),
    weight: [F_in, F_out], bias: [F_out] or None."""
    n, f_in = x.shape
    f_out = weight.shape[1]

    # ---- tiling / padding geometry ----------------------------------------
    f_in_p = _round_up(f_in, 128)            # lane-dense contraction width
    f_out_p = _round_up(f_out, 128)          # lane-dense output width
    row_align = 8 if n < 128 else 128
    n_rows_p = _round_up(n, row_align)
    n_cols_p = _round_up(n, 128)

    # Keep x resident in VMEM (single DMA) when small; else tile over k and
    # use a larger row tile so the x re-stream amortizes.
    x_bytes = n_cols_p * f_in_p * 2          # bf16
    x_resident = x_bytes <= 8 * 1024 * 1024
    tm_max = tm if x_resident else max(tm, 512)
    tm = _pick_tile(n_rows_p, tm_max, row_align)
    tk = _pick_tile(n_cols_p, tk, 128)
    grid = (n_rows_p // tm, n_cols_p // tk)

    # ---- operand prep (wrapper-side XLA glue) -----------------------------
    # adj: pad only when the tile grid requires it; keep caller dtype (f32 or
    # bf16) -> no extra O(N^2) HBM cast pass; the kernel casts per-tile.
    if (n_rows_p, n_cols_p) != (n, n):
        adj_in = jnp.zeros((n_rows_p, n_cols_p), adj.dtype).at[:n, :n].set(adj)
    else:
        adj_in = adj

    # x / W / bias are O(N*F) / O(F^2): pad lane-dense, cast once to bf16.
    x_p = jnp.zeros((n_cols_p, f_in_p), jnp.bfloat16).at[:n, :f_in].set(
        x.astype(jnp.bfloat16))
    w_p = jnp.zeros((f_in_p, f_out_p), jnp.bfloat16).at[:f_in, :f_out].set(
        weight.astype(jnp.bfloat16))
    b_p = jnp.zeros((1, f_out_p), jnp.float32)
    if bias is not None:
        b_p = b_p.at[0, :f_out].set(bias.astype(jnp.float32))

    if x_resident:
        x_spec = pl.BlockSpec((n_cols_p, f_in_p), lambda i, k: (0, 0))
        x_traffic = x_p.size * 2                       # streamed once
    else:
        x_spec = pl.BlockSpec((tk, f_in_p), lambda i, k: (k, 0))
        x_traffic = grid[0] * x_p.size * 2             # re-streamed per row tile

    adj_item = adj_in.dtype.itemsize
    out_item = jnp.dtype(out_dtype).itemsize

    cost = pl.CostEstimate(
        flops=2 * n_rows_p * n_cols_p * f_in_p + 2 * n_rows_p * f_in_p * f_out_p,
        transcendentals=0,
        bytes_accessed=(adj_in.size * adj_item + x_traffic
                        + w_p.size * 2 + b_p.size * 4
                        + n_rows_p * f_out_p * out_item),
    )

    # VMEM working set (double-buffered pipeline buffers + scratch); cap the
    # scoped limit below v7x's 64 MiB physical VMEM, floor above v5e's 16 MiB
    # default so the resident-x / larger-tile config always fits.
    x_vmem = 2 * (x_p.size * 2 if x_resident else tk * f_in_p * 2)
    vmem_need = (2 * tm * tk * adj_item + x_vmem
                 + 2 * w_p.size * 2 + 2 * b_p.size * 4
                 + tm * f_in_p * 4 + 2 * tm * f_out_p * out_item)
    vmem_limit = int(min(max(vmem_need * 3 // 2, 32 * 1024 * 1024),
                         48 * 1024 * 1024))

    out_p = pl.pallas_call(
        _make_kernel(x_resident, tk),
        out_shape=jax.ShapeDtypeStruct((n_rows_p, f_out_p), out_dtype),
        grid_spec=pltpu.PrefetchScalarGridSpec(
            num_scalar_prefetch=0,
            grid=grid,
            in_specs=[
                pl.BlockSpec((tm, tk), lambda i, k: (i, k)),           # adj tile
                x_spec,                                                # x (resident or k-tiled)
                pl.BlockSpec((f_in_p, f_out_p), lambda i, k: (0, 0)),  # W (whole, bf16)
                pl.BlockSpec((1, f_out_p), lambda i, k: (0, 0)),       # bias
            ],
            out_specs=pl.BlockSpec((tm, f_out_p), lambda i, k: (i, 0)),
            scratch_shapes=[pltpu.VMEM((tm, f_in_p), jnp.float32)],
        ),
        compiler_params=pltpu.CompilerParams(
            dimension_semantics=("parallel", "arbitrary"),
            vmem_limit_bytes=vmem_limit,
        ),
        cost_estimate=cost,
    )(adj_in, x_p, w_p, b_p)

    return out_p[:n, :f_out]


if __name__ == "__main__":
    key = jax.random.PRNGKey(0)
    k_x, k_adj, k_w, k_b = jax.random.split(key, 4)

    # Small shapes consistent with the module's forward.
    N = 16        # number of graph nodes
    F_IN = 8      # in_features
    F_OUT = 32    # out_features

    # Deterministic parameter init mirroring reset_parameters():
    # uniform(-stdv, stdv) with stdv = 1/sqrt(out_features).
    stdv = 1.0 / math.sqrt(F_OUT)
    weight = jax.random.uniform(
        k_w, (F_IN, F_OUT), minval=-stdv, maxval=stdv, dtype=jnp.float32)
    bias = jax.random.uniform(
        k_b, (F_OUT,), minval=-stdv, maxval=stdv, dtype=jnp.float32)

    # Node features.
    x = jax.random.normal(k_x, (N, F_IN), dtype=jnp.float32)

    # adj = D^-1 A from a random 0/1 adjacency with self-loops (JAX glue).
    a = (jax.random.uniform(k_adj, (N, N)) < 0.3).astype(jnp.float32)
    a = jnp.minimum(a + jnp.eye(N, dtype=jnp.float32), 1.0)
    adj = a / jnp.sum(a, axis=1, keepdims=True)   # row-normalized: D^-1 A

    out = jax.block_until_ready(spatial_gcn_layer(x, adj, weight, bias))
    assert out.shape == (N, F_OUT)

    # Reference matched to the kernel's bf16 operand casts (f32 accumulation,
    # bf16 epilogue operands).
    adj_b = adj.astype(jnp.bfloat16).astype(jnp.float32)
    x_b = x.astype(jnp.bfloat16).astype(jnp.float32)
    agg_b = (adj_b @ x_b).astype(jnp.bfloat16).astype(jnp.float32)
    w_b = weight.astype(jnp.bfloat16).astype(jnp.float32)
    ref = agg_b @ w_b + bias[None, :]
    assert jnp.allclose(out, ref, atol=2e-2, rtol=2e-2), "mismatch vs bf16 ref"

    # Loose sanity check vs the pure-f32 module semantics adj @ (x @ W) + b.
    ref_f32 = adj @ (x @ weight) + bias[None, :]
    assert jnp.allclose(out, ref_f32, atol=7e-2, rtol=7e-2), "mismatch vs f32 ref"

    print("KERNEL_OK")
</pallas_src>

<mosaic_0001>
module attributes {stable_mosaic.version = 11 : i64} {
  func.func @kernel(%arg0: i32, %arg1: i32, %arg2: memref<16x128xf32, #tpu.memory_space<vmem>>, %arg3: memref<128x128xbf16, #tpu.memory_space<vmem>>, %arg4: memref<128x128xbf16, #tpu.memory_space<vmem>>, %arg5: memref<1x128xf32, #tpu.memory_space<vmem>>, %arg6: memref<16x128xf32, #tpu.memory_space<vmem>>, %arg7: memref<16x128xf32, #tpu.memory_space<vmem>>) attributes {dimension_semantics = [#tpu.dimension_semantics<parallel>, #tpu.dimension_semantics<arbitrary>], iteration_bounds = array<i64: 1, 1>, scalar_prefetch = 0 : i64, scratch_operands = 1 : i64, tpu.core_type = #tpu.core_type<tc>, window_params = [{transform_indices = @transform_0, window_bounds = array<i64: 16, 128>}, {pipeline_mode = #tpu.pipeline_mode<synchronous>, transform_indices = @transform_1, window_bounds = array<i64: 128, 128>}, {pipeline_mode = #tpu.pipeline_mode<synchronous>, transform_indices = @transform_2, window_bounds = array<i64: 128, 128>}, {pipeline_mode = #tpu.pipeline_mode<synchronous>, transform_indices = @transform_3, window_bounds = array<i64: 1, 128>}, {transform_indices = @transform_4, window_bounds = array<i64: 16, 128>}]} {
    %c0_i32 = arith.constant 0 : i32
    %0 = arith.cmpi eq, %arg1, %c0_i32 : i32
    %1 = arith.extui %0 : i1 to i32
    %c0_i32_0 = arith.constant 0 : i32
    %2 = arith.cmpi ne, %1, %c0_i32_0 : i32
    scf.if %2 {
      %cst_9 = arith.constant 0.000000e+00 : f32
      %16 = vector.broadcast %cst_9 : f32 to vector<16x128xf32>
      %c0_10 = arith.constant 0 : index
      %c0_11 = arith.constant 0 : index
      %17 = vector.load %arg7[%c0_10, %c0_11] : memref<16x128xf32, #tpu.memory_space<vmem>>, vector<16x128xf32>
      tpu.vector_store %arg7[%c0_10, %c0_11], %16 {strides = array<i32>} : memref<16x128xf32, #tpu.memory_space<vmem>>, vector<16x128xf32>,
    } else {
    }
    %c0 = arith.constant 0 : index
    %c0_1 = arith.constant 0 : index
    %3 = vector.load %arg2[%c0, %c0_1] : memref<16x128xf32, #tpu.memory_space<vmem>>, vector<16x128xf32>
    %4 = arith.truncf %3 : vector<16x128xf32> to vector<16x128xbf16>
    %c128_i32 = arith.constant 128 : i32
    %5 = arith.muli %arg1, %c128_i32 : i32
    %6 = tpu.assume_multiple %5, 128 : i32
    %7 = arith.index_cast %6 : i32 to index
    %c0_2 = arith.constant 0 : index
    %8 = vector.load %arg3[%7, %c0_2] : memref<128x128xbf16, #tpu.memory_space<vmem>>, vector<128x128xbf16>
    %c0_3 = arith.constant 0 : index
    %c0_4 = arith.constant 0 : index
    %9 = vector.load %arg7[%c0_3, %c0_4] : memref<16x128xf32, #tpu.memory_space<vmem>>, vector<16x128xf32>
    %cst = arith.constant dense<0.000000e+00> : vector<16x128xf32>
    %10 = tpu.matmul %4, %8, %cst {dimension_numbers = #tpu.dot_dimension_numbers<[1], [0], [0], [1], [0, 0, 1, 1], [], []>} : vector<16x128xbf16>, vector<128x128xbf16>, vector<16x128xf32> -> vector<16x128xf32>
    %11 = arith.addf %9, %10 : vector<16x128xf32>
    %c0_5 = arith.constant 0 : index
    %c0_6 = arith.constant 0 : index
    %12 = vector.load %arg7[%c0_5, %c0_6] : memref<16x128xf32, #tpu.memory_space<vmem>>, vector<16x128xf32>
    tpu.vector_store %arg7[%c0_5, %c0_6], %11 {strides = array<i32>} : memref<16x128xf32, #tpu.memory_space<vmem>>, vector<16x128xf32>,
    %c0_i32_7 = arith.constant 0 : i32
    %13 = arith.cmpi eq, %arg1, %c0_i32_7 : i32
    %14 = arith.extui %13 : i1 to i32
    %c0_i32_8 = arith.constant 0 : i32
    %15 = arith.cmpi ne, %14, %c0_i32_8 : i32
    scf.if %15 {
      %c0_9 = arith.constant 0 : index
      %c0_10 = arith.constant 0 : index
      %16 = vector.load %arg7[%c0_9, %c0_10] : memref<16x128xf32, #tpu.memory_space<vmem>>, vector<16x128xf32>
      %17 = arith.truncf %16 : vector<16x128xf32> to vector<16x128xbf16>
      %c0_11 = arith.constant 0 : index
      %c0_12 = arith.constant 0 : index
      %18 = vector.load %arg4[%c0_11, %c0_12] : memref<128x128xbf16, #tpu.memory_space<vmem>>, vector<128x128xbf16>
      %cst_13 = arith.constant dense<0.000000e+00> : vector<16x128xf32>
      %19 = tpu.matmul %17, %18, %cst_13 {dimension_numbers = #tpu.dot_dimension_numbers<[1], [0], [0], [1], [0, 0, 1, 1], [], []>} : vector<16x128xbf16>, vector<128x128xbf16>, vector<16x128xf32> -> vector<16x128xf32>
      %c0_14 = arith.constant 0 : index
      %c0_15 = arith.constant 0 : index
      %20 = vector.load %arg5[%c0_14, %c0_15] : memref<1x128xf32, #tpu.memory_space<vmem>>, vector<1x128xf32>
      %21 = vector.broadcast %20 : vector<1x128xf32> to vector<16x128xf32>
      %22 = arith.addf %19, %21 : vector<16x128xf32>
      %c0_16 = arith.constant 0 : index
      %c0_17 = arith.constant 0 : index
      %23 = vector.load %arg6[%c0_16, %c0_17] : memref<16x128xf32, #tpu.memory_space<vmem>>, vector<16x128xf32>
      tpu.vector_store %arg6[%c0_16, %c0_17], %22 {strides = array<i32>} : memref<16x128xf32, #tpu.memory_space<vmem>>, vector<16x128xf32>,
    } else {
    }
    return
  }
  func.func @transform_0(%arg0: i32, %arg1: i32) -> (i32, i32) {
    %c0_i32 = arith.constant 0 : i32
    return %arg0, %arg1 : i32, i32
  }
  func.func @transform_1(%arg0: i32, %arg1: i32) -> (i32, i32) {
    %c0_i32 = arith.constant 0 : i32
    %c0_i32_0 = arith.constant 0 : i32
    %c0_i32_1 = arith.constant 0 : i32
    return %c0_i32, %c0_i32_0 : i32, i32
  }
  func.func @transform_2(%arg0: i32, %arg1: i32) -> (i32, i32) {
    %c0_i32 = arith.constant 0 : i32
    %c0_i32_0 = arith.constant 0 : i32
    %c0_i32_1 = arith.constant 0 : i32
    return %c0_i32, %c0_i32_0 : i32, i32
  }
  func.func @transform_3(%arg0: i32, %arg1: i32) -> (i32, i32) {
    %c0_i32 = arith.constant 0 : i32
    %c0_i32_0 = arith.constant 0 : i32
    %c0_i32_1 = arith.constant 0 : i32
    return %c0_i32, %c0_i32_0 : i32, i32
  }
  func.func @transform_4(%arg0: i32, %arg1: i32) -> (i32, i32) {
    %c0_i32 = arith.constant 0 : i32
    %c0_i32_0 = arith.constant 0 : i32
    return %arg0, %c0_i32 : i32, i32
  }
}

</mosaic_0001>

<bundles_post_ra>
// kernel: tpu_custom_call.1
= control target key start
LH: loop header
LB: loop body
LE: loop exit
PB: predicated region body
PF: predicated region fallthrough
CT: control target
= control target key end

     0   :  { %9 = vsyncpa [#allocation4], 0  ;;  %s520_s0 = inlined_call_operand.hbm [shape: f32[16,128], index: 0, kind: input, shape index: {}]   ;;  %s521_s1 = inlined_call_operand.hbm [shape: bf16[128,128], index: 1, kind: input, shape index: {}]   ;;  %s522_s2 = inlined_call_operand.hbm [shape: bf16[128,128], index: 2, kind: input, shape index: {}]   ;;  %s523_s3 = inlined_call_operand.vmem [shape: f32[1,128], index: 3, kind: input, shape index: {}]   ;;  %s524_s4 = inlined_call_operand.hbm [shape: f32[16,128], index: 4, kind: output, shape index: {}]  }
   0x1   :  { %10 = vsyncpa [#allocation7], 0  ;;  %s29_s17 = sshll.u32 %s521_s1, 4  ;;  %s30_s17 = int_to_ptr.hbm [resolvable:$true] %s29_s17 }
   0x2   :  { %11 = vsyncpa [#allocation5], 0  ;;  %s466_s18 = smov [#allocation6]   ;;  %s16_s22 = sshll.u32 %s520_s0, 4  ;;  %s17_s22 = int_to_ptr.hbm [resolvable:$true] %s16_s22 }
   0x3   :  { %s31_s19 = sshll.u32 %s466_s18, 4  ;;  %s467_s23 = smov 64   ;;  %s32_s19 = int_to_ptr.vmem [resolvable:$true] %s31_s19 }
   0x4   :  { %s468_s24 = smov 4   ;;  %s469_s25 = smov [#allocation3]  }
   0x5   :  { %37 = dma.hbm_to_vmem [thread:$0]  %s30_s17, 1024, %s32_s19, [#allocation7], %s467_s23, %s467_s23, %s468_s24  }
   0x6   :  { %s18_s26 = sshll.u32 %s469_s25, 4  ;;  %s470_s27 = smov 128   ;;  %s19_s26 = int_to_ptr.vmem [resolvable:$true] %s18_s26 }
   0x7   :  { %s471_s28 = smov 8   ;;  %s42_s30 = sshll.u32 %s522_s2, 4  ;;  %s43_s30 = int_to_ptr.hbm [resolvable:$true] %s42_s30 }
   0x8   :  { %24 = dma.hbm_to_vmem [thread:$0]  %s17_s22, 256, %s19_s26, [#allocation4], %s470_s27, %s470_s27, %s471_s28  }
   0x9   :  { %s472_s5 = smov [#allocation8]  }
   0xa   :  { %s44_s0 = sshll.u32 %s472_s5, 4  ;;  %s45_s0 = int_to_ptr.vmem [resolvable:$true] %s44_s0 }
   0xb   :  { %50 = dma.hbm_to_vmem [thread:$0]  %s43_s30, 1024, %s45_s0, [#allocation7], %s467_s23, %s467_s23, %s468_s24  }
   0xc   :  { %460 = dma.done.wait [#allocation4], 256  }
   0xd   :  { %461 = vsyncadd [#allocation4], 4294967040 }
   0xe   :  { %462 = dma.done.wait [#allocation7], 2048  }
   0xf   :  { %463 = vsyncadd [#allocation7], 4294965248  ;;  %v346_v0 = vld [vmem:[#allocation6 + $0x38] sm:$0xff]  ;;  %v345_v1 = vld [vmem:[#allocation6 + $0x30] sm:$0xff]  ;;  %s473_s7 = smov [#allocation9]   ;;  %s259_s11 = sshll.u32 %s524_s4, 4  ;;  %s260_s11 = int_to_ptr.hbm [resolvable:$true] %s259_s11 }
  0x10   :  { %145 = vmatpush.bf16.msra.mxu0 %v346_v0  ;;  %v354_v2 = vld [vmem:[#allocation8 + $0x38] sm:$0xff]  ;;  %v353_v3 = vld [vmem:[#allocation8 + $0x30] sm:$0xff]  ;;  %v344_v4 = vld [vmem:[#allocation6 + $0x28] sm:$0xff]  ;;  %s257_s8 = sshll.u32 %s473_s7, 4  ;;  %s258_s8 = int_to_ptr.vmem [resolvable:$true] %s257_s8 }
  0x11   :  { %237 = vmatpush.bf16.msra.mxu1 %v354_v2  ;;  %v352_v5 = vld [vmem:[#allocation8 + $0x28] sm:$0xff]  ;;  %v343_v6 = vld [vmem:[#allocation6 + $0x20] sm:$0xff]  ;;  %v342_v8 = vld [vmem:[#allocation6 + $0x18] sm:$0xff] }
  0x12   :  { %v351_v7 = vld [vmem:[#allocation8 + $0x20] sm:$0xff]  ;;  %v350_v9 = vld [vmem:[#allocation8 + $0x18] sm:$0xff]  ;;  %v341_v10 = vld [vmem:[#allocation6 + $0x10] sm:$0xff] }
  0x13   :  { %v340_v11 = vld [vmem:[#allocation6 + $0x8] sm:$0xff]  ;;  %v339_v12 = vld [vmem:[#allocation6] sm:$0xff]  ;;  %v71_v13 = vld [vmem:[#allocation3] sm:$0xff] }
  0x14   :  { %146 = vmatpush.bf16.msra.mxu0 %v345_v1  ;;  %v72_v14 = vld [vmem:[#allocation3 + $0x8] sm:$0xff]  ;;  %v349_v16 = vld [vmem:[#allocation8 + $0x10] sm:$0xff]  ;;  %v348_v17 = vld [vmem:[#allocation8 + $0x8] sm:$0xff] }
  0x15   :  { %238 = vmatpush.bf16.msra.mxu1 %v353_v3  ;;  %v73_v15 = vpack.c.bf16 %v72_v14, %v71_v13  ;;  %v347_v18 = vld [vmem:[#allocation8] sm:$0xff]  ;;  %v363_v22 = vld [vmem:[%s523_s3] ss:$0 sm:$0xff] }
  0x18   :  { %147 = vmatpush.bf16.msra.mxu0 %v344_v4 }
  0x19   :  { %239 = vmatpush.bf16.msra.mxu1 %v352_v5 }
  0x1c   :  { %148 = vmatpush.bf16.msra.mxu0 %v343_v6 }
  0x1d   :  { %240 = vmatpush.bf16.msra.mxu1 %v351_v7 }
  0x20   :  { %149 = vmatpush.bf16.msra.mxu0 %v342_v8 }
  0x21   :  { %241 = vmatpush.bf16.msra.mxu1 %v350_v9 }
  0x24   :  { %150 = vmatpush.bf16.msra.mxu0 %v341_v10 }
  0x25   :  { %242 = vmatpush.bf16.msra.mxu1 %v349_v16 }
  0x28   :  { %151 = vmatpush.bf16.msra.mxu0 %v340_v11 }
  0x29   :  { %243 = vmatpush.bf16.msra.mxu1 %v348_v17 }
  0x2c   :  { %152 = vmatpush.bf16.msra.mxu0 %v339_v12 }
  0x2d   :  { %244 = vmatpush.bf16.msra.mxu1 %v347_v18 }
  0x2f   :  { %153 = vmatmul.bf16.vlgmr.msra.gmra.mxu0 %v73_v15 }
  0xac   :  { %v154_v19 = vpop.f32.mrf.mxu0 }
  0xb4   :  { %v156_v20 = vpop.f32.mrf.mxu0 }
  0xb5   :  { %v168_v21 = vpack.c.bf16 %v156_v20, %v154_v19 }
  0xb7   :  { %245 = vmatmul.bf16.vlgmr.msra.gmra.mxu1 %v168_v21 }
 0x134   :  { %v246_v23 = vpop.f32.mrf.mxu1 }
 0x135   :  { %v247_v24 = vadd.f32 %v363_v22, %v246_v23 }
 0x137   :  { %251 = vst [vmem:[#allocation9] sm:$0xff] %v247_v24 }
 0x13c   :  { %v248_v25 = vpop.f32.mrf.mxu1 }
 0x13d   :  { %v249_v26 = vadd.f32 %v363_v22, %v248_v25 }
 0x13f   :  { %252 = vst [vmem:[#allocation9 + $0x8] sm:$0xff] %v249_v26 }
 0x140   :  { %265 = dma.vmem_to_hbm [thread:$0]  %s258_s8, 256, %s260_s11, [#allocation5], %s470_s27, %s470_s27, %s471_s28  }
 0x141   :  { %464 = dma.done.wait [#allocation5], 256  }
 0x142   :  { %465 = vsyncadd [#allocation5], 4294967040 }
 0x143   :  { %270 = vsyncpa [#allocation4], 1 }
 0x144   :  { %271 = vsyncpa [#allocation7], 1 }
 0x145   :  { %272 = vsyncpa [#allocation5], 1 }

</bundles_post_ra>
